<compile_context>
chip_gen: v6e
topology: v6e:2x2x1
jax: 0.10.0
libtpu: 0.0.40
codegen_flags: <defaults>
</compile_context>

<pallas_src>
import math

import jax
import jax.numpy as jnp
from jax.experimental import pallas as pl
from jax.experimental.pallas import tpu as pltpu


def _groupwise_linear_kernel(w_ref, b_ref, x_ref, o_ref):
    # w_ref: (1, C, D) f32, grid-resident (constant index_map -> DMA'd once).
    # b_ref: (1, C)    f32, grid-resident.
    # x_ref: (TB, C, D) streamed batch tile (input dtype, double-buffered).
    # o_ref: (TB, C)   output tile.
    x = x_ref[...].astype(jnp.float32)        # no-op for f32 inputs
    red = jnp.sum(x * w_ref[...], axis=-1)    # VPU mul + XLU reduce, f32 accumulate
    o_ref[...] = (red + b_ref[...]).astype(o_ref.dtype)


def _vmem_capacity_bytes():
    """Physical VMEM of the current generation (fallback: 128 MiB v5e/v6e)."""
    try:
        cap = int(pltpu.get_tpu_info().vmem_capacity_bytes)
        if cap > 0:
            return cap
    except Exception:
        pass
    return 128 << 20


def _plan_tiles(B, C, D, x_itemsize, out_itemsize, block_b=None):
    """Pick the batch tile TB and the scoped-VMEM limit, generation-aware."""
    vmem_cap = _vmem_capacity_bytes()
    # Scoped-VMEM ceiling: ~75% of physical -> 96 MiB on 128 MiB parts
    # (v5e/v6e), 48 MiB on 64 MiB parts (v7x).
    vmem_ceiling = min((vmem_cap * 3) // 4, 96 << 20)
    # Per-buffer x DMA budget: 16 MiB where VMEM is plentiful (v5e/v6e),
    # 8 MiB on v7x to keep headroom for the f32 temporaries.
    x_buf_budget = (16 << 20) if vmem_cap >= (96 << 20) else (8 << 20)

    row_x = C * D * x_itemsize
    # Per-batch-row VMEM cost of one in-flight grid step:
    #   2x double-buffered x rows
    # + f32 body temporaries (upcast copy of x when x is narrow + product slab)
    # + 2x double-buffered output rows.
    temp_per_row = C * D * 4 * (2 if x_itemsize < 4 else 1)
    per_row = 2 * row_x + temp_per_row + 2 * C * out_itemsize
    # Grid-resident data + slack: f32 W, f32 bias, misc compiler scratch.
    resident = C * D * 4 + C * 4 + (2 << 20)

    hard_max = (vmem_ceiling - resident) // per_row      # VMEM feasibility
    if hard_max < 1:
        # TODO(synk): add a hidden_dim grid axis (partial-sum accumulation in
        # a VMEM scratch with pl.when init/finalize) for shapes where a single
        # (num_class, hidden_dim) row exceeds the scoped-VMEM budget.
        raise ValueError(
            "GroupWiseLinear row (num_class*hidden_dim) too large for VMEM; "
            "a hidden_dim grid split is required")

    soft_max = max(x_buf_budget // max(row_x, 1), 1)     # DMA-amortization target
    tb = min(hard_max, soft_max, B)
    if block_b is not None:
        # User hint: shrink (never grow past the VMEM-safe maximum).
        tb = min(tb, max(int(block_b), 1))
    if tb < B:
        # Output block (TB, C): TB is the sublane dim -> multiple of 8.
        tb = (tb // 8) * 8
        if tb < 8:
            raise ValueError(
                "cannot fit an 8-row batch tile in VMEM; a hidden_dim grid "
                "split is required")

    need = tb * per_row + resident                       # <= vmem_ceiling by construction
    vmem_limit = int(min(max(need, 32 << 20), vmem_ceiling))
    return tb, vmem_limit


def groupwise_linear(x, W, b, *, block_b=None, out_dtype=None):
    """GroupWiseLinear forward. x: (B, C, D), W: (1, C, D), b: (1, C) -> (B, C)."""
    B, C, D = x.shape
    assert W.shape == (1, C, D), W.shape
    assert b.shape == (1, C), b.shape
    out_dtype = x.dtype if out_dtype is None else jnp.dtype(out_dtype)

    tb, vmem_limit = _plan_tiles(B, C, D, x.dtype.itemsize,
                                 jnp.dtype(out_dtype).itemsize, block_b)
    nb = pl.cdiv(B, tb)

    # Hoist the W / bias f32 casts out of the per-step body: both operands are
    # grid-resident, so the cast happens exactly once (cheap XLA op; extra HBM
    # traffic is only C*D*2 bytes for bf16 weights).
    W_f32 = W.astype(jnp.float32)
    b_f32 = b.astype(jnp.float32)

    bytes_accessed = (B * C * D * x.dtype.itemsize       # x streamed once
                      + C * D * 4 + C * 4                # resident f32 W / bias
                      + B * C * jnp.dtype(out_dtype).itemsize)
    cost = pl.CostEstimate(flops=2 * B * C * D, transcendentals=0,
                           bytes_accessed=bytes_accessed)

    return pl.pallas_call(
        _groupwise_linear_kernel,
        out_shape=jax.ShapeDtypeStruct((B, C), out_dtype),
        grid=(nb,),
        in_specs=[
            # W / bias: constant block index -> DMA'd once, VMEM-resident.
            pl.BlockSpec((1, C, D), lambda i: (0, 0, 0)),
            pl.BlockSpec((1, C), lambda i: (0, 0)),
            # x: streamed batch tiles, double-buffered by the Pallas pipeline.
            pl.BlockSpec((tb, C, D), lambda i: (i, 0, 0)),
        ],
        out_specs=pl.BlockSpec((tb, C), lambda i: (i, 0)),
        compiler_params=pltpu.CompilerParams(
            # Independent batch tiles -> megacore-shardable.  On v7x, verify in
            # xprof that both TensorCores ingest tiles; switch the batch axis
            # to pltpu.CORE_PARALLEL if one core cannot saturate 3.2 TB/s.
            dimension_semantics=("parallel",),
            vmem_limit_bytes=vmem_limit,
        ),
        cost_estimate=cost,
    )(W_f32, b_f32, x)


def init_groupwise_linear_params(key, num_class, hidden_dim, bias=True,
                                 dtype=jnp.float32):
    """Deterministic re-implementation of GroupWiseLinear.reset_parameters."""
    stdv = 1.0 / math.sqrt(hidden_dim)
    k_w, k_b = jax.random.split(key)
    W = jax.random.uniform(k_w, (1, num_class, hidden_dim),
                           minval=-stdv, maxval=stdv, dtype=dtype)
    b = (jax.random.uniform(k_b, (1, num_class),
                            minval=-stdv, maxval=stdv, dtype=dtype)
         if bias else jnp.zeros((1, num_class), dtype=dtype))
    return W, b


if __name__ == "__main__":
    key = jax.random.PRNGKey(0)

    def ref_fn(x, W, b):
        # Pure-JAX reference mirroring the PyTorch forward (f32 accumulate).
        return (jnp.sum(W.astype(jnp.float32) * x.astype(jnp.float32), axis=-1)
                + b.astype(jnp.float32))

    # 1) Small shapes consistent with the module (single block along batch).
    B, C, D = 2, 8, 128
    k_p, k_x, key = jax.random.split(key, 3)
    W, b = init_groupwise_linear_params(k_p, C, D, bias=True)
    x = jax.random.normal(k_x, (B, C, D), dtype=jnp.float32)
    out = jax.block_until_ready(groupwise_linear(x, W, b))
    assert out.shape == (B, C)
    assert jnp.allclose(out, ref_fn(x, W, b).astype(out.dtype),
                        atol=1e-4, rtol=1e-4)

    # 2) Larger batch with an explicit small tile -> pipelined multi-tile grid
    #    (grid=(4,)) with resident-W reuse across tiles.
    B2 = 256
    k_x2, key = jax.random.split(key)
    x2 = jax.random.normal(k_x2, (B2, C, D), dtype=jnp.float32)
    out2 = jax.block_until_ready(groupwise_linear(x2, W, b, block_b=64))
    assert out2.shape == (B2, C)
    assert jnp.allclose(out2, ref_fn(x2, W, b).astype(out2.dtype),
                        atol=1e-4, rtol=1e-4)

    # 3) bf16 inputs, f32 accumulation inside the kernel, f32 output.
    B3, C3, D3 = 64, 16, 256
    k_p3, k_x3, key = jax.random.split(key, 3)
    W3, b3 = init_groupwise_linear_params(k_p3, C3, D3, dtype=jnp.bfloat16)
    x3 = jax.random.normal(k_x3, (B3, C3, D3), dtype=jnp.bfloat16)
    out3 = jax.block_until_ready(
        groupwise_linear(x3, W3, b3, out_dtype=jnp.float32))
    assert out3.shape == (B3, C3)
    assert jnp.allclose(out3, ref_fn(x3, W3, b3), atol=1e-3, rtol=1e-3)

    # 4) Uneven batch: partial last tile (masked writeback of OOB rows).
    B4 = 50
    k_x4, key = jax.random.split(key)
    x4 = jax.random.normal(k_x4, (B4, C, D), dtype=jnp.float32)
    out4 = jax.block_until_ready(groupwise_linear(x4, W, b, block_b=16))
    assert out4.shape == (B4, C)
    assert jnp.allclose(out4, ref_fn(x4, W, b).astype(out4.dtype),
                        atol=1e-4, rtol=1e-4)

    print("KERNEL_OK")
</pallas_src>

<mosaic_0001>
module attributes {stable_mosaic.version = 11 : i64} {
  func.func @_groupwise_linear_kernel(%arg0: i32, %arg1: memref<1x8x128xf32, #tpu.memory_space<vmem>>, %arg2: memref<1x8xf32, #tpu.memory_space<vmem>>, %arg3: memref<2x8x128xf32, #tpu.memory_space<vmem>>, %arg4: memref<2x8xf32, #tpu.memory_space<vmem>>) attributes {dimension_semantics = [#tpu.dimension_semantics<parallel>], iteration_bounds = array<i64: 1>, scalar_prefetch = 0 : i64, scratch_operands = 0 : i64, tpu.core_type = #tpu.core_type<tc>, window_params = [{pipeline_mode = #tpu.pipeline_mode<synchronous>, transform_indices = @transform_0, window_bounds = array<i64: 1, 8, 128>}, {pipeline_mode = #tpu.pipeline_mode<synchronous>, transform_indices = @transform_1, window_bounds = array<i64: 1, 8>}, {transform_indices = @transform_2, window_bounds = array<i64: 2, 8, 128>}, {transform_indices = @transform_3, window_bounds = array<i64: 2, 8>}]} {
    %c0 = arith.constant 0 : index
    %c0_0 = arith.constant 0 : index
    %c0_1 = arith.constant 0 : index
    %0 = vector.load %arg3[%c0, %c0_0, %c0_1] : memref<2x8x128xf32, #tpu.memory_space<vmem>>, vector<2x8x128xf32>
    %c0_2 = arith.constant 0 : index
    %c0_3 = arith.constant 0 : index
    %c0_4 = arith.constant 0 : index
    %1 = vector.load %arg1[%c0_2, %c0_3, %c0_4] : memref<1x8x128xf32, #tpu.memory_space<vmem>>, vector<1x8x128xf32>
    %2 = vector.broadcast %1 : vector<1x8x128xf32> to vector<2x8x128xf32>
    %3 = arith.mulf %0, %2 : vector<2x8x128xf32>
    %cst = arith.constant dense<0.000000e+00> : vector<2x8xf32>
    %4 = vector.multi_reduction <add>, %3, %cst [2] : vector<2x8x128xf32> to vector<2x8xf32>
    %c0_5 = arith.constant 0 : index
    %c0_6 = arith.constant 0 : index
    %5 = vector.load %arg2[%c0_5, %c0_6] : memref<1x8xf32, #tpu.memory_space<vmem>>, vector<1x8xf32>
    %6 = vector.broadcast %5 : vector<1x8xf32> to vector<2x8xf32>
    %7 = arith.addf %4, %6 : vector<2x8xf32>
    %c0_7 = arith.constant 0 : index
    %c0_8 = arith.constant 0 : index
    %8 = vector.load %arg4[%c0_7, %c0_8] : memref<2x8xf32, #tpu.memory_space<vmem>>, vector<2x8xf32>
    tpu.vector_store %arg4[%c0_7, %c0_8], %7 {strides = array<i32>} : memref<2x8xf32, #tpu.memory_space<vmem>>, vector<2x8xf32>,
    return
  }
  func.func @transform_0(%arg0: i32) -> (i32, i32, i32) {
    %c0_i32 = arith.constant 0 : i32
    %c0_i32_0 = arith.constant 0 : i32
    %c0_i32_1 = arith.constant 0 : i32
    %c0_i32_2 = arith.constant 0 : i32
    return %c0_i32, %c0_i32_0, %c0_i32_1 : i32, i32, i32
  }
  func.func @transform_1(%arg0: i32) -> (i32, i32) {
    %c0_i32 = arith.constant 0 : i32
    %c0_i32_0 = arith.constant 0 : i32
    %c0_i32_1 = arith.constant 0 : i32
    return %c0_i32, %c0_i32_0 : i32, i32
  }
  func.func @transform_2(%arg0: i32) -> (i32, i32, i32) {
    %c0_i32 = arith.constant 0 : i32
    %c0_i32_0 = arith.constant 0 : i32
    %c0_i32_1 = arith.constant 0 : i32
    return %arg0, %c0_i32, %c0_i32_0 : i32, i32, i32
  }
  func.func @transform_3(%arg0: i32) -> (i32, i32) {
    %c0_i32 = arith.constant 0 : i32
    %c0_i32_0 = arith.constant 0 : i32
    return %arg0, %c0_i32 : i32, i32
  }
}

</mosaic_0001>

<bundles_post_ra>
// kernel: tpu_custom_call.1
= control target key start
LH: loop header
LB: loop body
LE: loop exit
PB: predicated region body
PF: predicated region fallthrough
CT: control target
= control target key end

     0   :  { %8 = vsyncpa [#allocation3], 0  ;;  %s214_s0 = inlined_call_operand.hbm [shape: f32[1,8,128], index: 0, kind: input, shape index: {}]   ;;  %s215_s1 = inlined_call_operand.vmem [shape: f32[1,8], index: 1, kind: input, shape index: {}]   ;;  %s216_s2 = inlined_call_operand.hbm [shape: f32[2,8,128], index: 2, kind: input, shape index: {}]   ;;  %s217_s3 = inlined_call_operand.hbm [shape: f32[2,8], index: 3, kind: output, shape index: {}]  }
   0x1   :  { %9 = vsyncpa [#allocation6], 0 }
   0x2   :  { %10 = vsyncpa [#allocation4], 0  ;;  %s176_s12 = smov [#allocation2]   ;;  %s177_s14 = smov [#allocation5]  }
   0x3   :  { %s17_s13 = sshll.u32 %s176_s12, 4  ;;  %s28_s15 = sshll.u32 %s177_s14, 4  ;;  %s18_s13 = int_to_ptr.vmem [resolvable:$true] %s17_s13  ;;  %s29_s15 = int_to_ptr.vmem [resolvable:$true] %s28_s15 }
   0x4   :  { %s118_s16 = scalar_lea.vmem %s18_s13, 128  ;;  %p123_p1 = scmp.lt.s32.totalorder %s18_s13, %s18_s13 }
   0x5   :  { %p119_p0 = scmp.ne.s32.totalorder %s18_s13, %s118_s16  ;;  %p124_p2 = scmp.lt.s32.totalorder %s118_s16, %s118_s16 }
   0x7   :  { %p125_p3 = por %p124_p2, %p123_p1 }
   0x9   :  { %p126_p4 = pnand %p125_p3, %p119_p0 }
   0xb   :  { %129 = shalt.err (!%p126_p4)
}
   0xc   :  { %20 = dma.hbm_to_vmem [thread:$0]  %s214_s0, 128, %s18_s13, [#allocation3]  }
   0xd   :  { %s138_s19 = scalar_lea.vmem %s29_s15, 256  ;;  %p143_p6 = scmp.lt.s32.totalorder %s29_s15, %s29_s15 }
   0xe   :  { %p139_p5 = scmp.ne.s32.totalorder %s29_s15, %s138_s19  ;;  %p144_p7 = scmp.lt.s32.totalorder %s138_s19, %s138_s19 }
  0x10   :  { %p145_p8 = por %p144_p7, %p143_p6 }
  0x12   :  { %p146_p9 = pnand %p145_p8, %p139_p5 }
  0x14   :  { %149 = shalt.err (!%p146_p9)
}
  0x15   :  { %s178_s20 = smov 128   ;;  %s179_s21 = smov 8  }
  0x16   :  { %34 = dma.hbm_to_vmem [thread:$0]  %s216_s2, 256, %s29_s15, [#allocation6], %s178_s20, %s178_s20, %s179_s21  }
  0x17   :  { %170 = dma.done.wait [#allocation3], 128  }
  0x18   :  { %171 = vsyncadd [#allocation3], 4294967168 }
  0x19   :  { %172 = dma.done.wait [#allocation6], 256  }
  0x1a   :  { %173 = vsyncadd [#allocation6], 4294967040  ;;  %v41_v0 = vld [vmem:[#allocation5] sm:$0xff]  ;;  %v43_v1 = vld [vmem:[#allocation2] sm:$0xff]  ;;  %v180_v6 = vmov 0   ;;  %v70_v12 = vlaneseq  ;;  %vm80_vm0 = vcmask 1041409  }
  0x1b   :  { %v42_v2 = vld [vmem:[#allocation5 + $0x8] sm:$0xff]  ;;  %v44_v3 = vmul.f32 %v43_v1, %v41_v0  ;;  %v101_v4 = vld [vmem:[%s215_s1] ss:$0 sm:$0xff]  ;;  %108 = vset.pattern.permute.xlu1 %v180_v6  ;;  %109 = vset.pattern.permute.xlu0 %v180_v6  ;;  %s181_s1 = smov [#allocation7]   ;;  %vm83_vm1 = vcmask 58368  }
  0x1c   :  { %57 = vbcast.lane.b32.xlu1 %v101_v4, 256  ;;  %v45_v5 = vmul.f32 %v43_v1, %v42_v2  ;;  %v71_v13 = vand.u32 127, %v70_v12  ;;  %v73_v14 = vshrl.u32 %v70_v12, 7  ;;  %s91_s2 = sshll.u32 %s181_s1, 4  ;;  %s92_s2 = int_to_ptr.vmem [resolvable:$true] %s91_s2 }
  0x1d   :  { %46 = vadd.xlane.f32.xlu0 %v44_v3  ;;  %s150_s25 = scalar_lea.vmem %s92_s2, 32  ;;  %p155_p11 = scmp.lt.s32.totalorder %s92_s2, %s92_s2 }
  0x1e   :  { %v74_v15 = vsub.s32 %v71_v13, %v73_v14  ;;  %p151_p10 = scmp.ne.s32.totalorder %s92_s2, %s150_s25  ;;  %p156_p12 = scmp.lt.s32.totalorder %s150_s25, %s150_s25 }
  0x20   :  { %p157_p13 = por %p156_p12, %p155_p11 }
  0x21   :  { %48 = vadd.xlane.f32.xlu0 %v45_v5 }
  0x22   :  { %p158_p0 = pnand %p157_p13, %p151_p10 }
  0x8e   :  { %v58_v7 = vpop.permute.xlu1 %57 }
  0xa6   :  { %v47_v8 = vpop.xlane.xlu0 %46 }
  0xa7   :  { %v60_v9 = vadd.f32 %v58_v7, %v47_v8 }
  0xa9   :  { %65 = vperm.xlu1 %108, %v60_v9  }
  0xaa   :  { %v49_v10 = vpop.xlane.xlu0 %48 }
  0xab   :  { %v61_v11 = vadd.f32 %v58_v7, %v49_v10 }
  0xad   :  { %68 = vperm.xlu0 %109, %v61_v11  }
 0x124   :  { %v66_v16 = vpop.permute.xlu1 %65 }
 0x125   :  { %v75_v18 = vrot.slane %v66_v16, %v74_v15 }
 0x128   :  { %v69_v17 = vpop.permute.xlu0 %68 }
 0x129   :  { %v79_v19 = vrot.slane %v69_v17, %v74_v15 }
 0x12b   :  { %v81_v20 = vsel %vm80_vm0, %v79_v19, %v75_v18 }
 0x12c   :  { %84 = vst.msk [vmem:[#allocation7] sm:$0x3] %vm83_vm1, %v81_v20 }
 0x12d   :  { %161 = shalt.err (!%p158_p0)
}
 0x12e   :  { %94 = dma.vmem_to_hbm [thread:$0]  %s92_s2, 32, %s217_s3, [#allocation4]  }
 0x12f   :  { %174 = dma.done.wait [#allocation4], 32  }
 0x130   :  { %175 = vsyncadd [#allocation4], 4294967264 }
 0x131   :  { %98 = vsyncpa [#allocation3], 1 }
 0x132   :  { %99 = vsyncpa [#allocation6], 1 }
 0x133   :  { %100 = vsyncpa [#allocation4], 1 }

</bundles_post_ra>
